<compile_context>
chip_gen: v7x
topology: tpu7x:2x2x1
jax: 0.10.0
libtpu: 0.0.40
codegen_flags: <defaults>
</compile_context>

<pallas_src>
import jax
import jax.numpy as jnp
from jax.experimental import pallas as pl
from jax.experimental.pallas import tpu as pltpu


def _round_up(x, m):
    return (x + m - 1) // m * m


def _patch_embed_kernel(x_ref, w_ref, b_ref, o_ref):
    # One token tile: (tm, K) @ (K, Np) on the MXU with f32 accumulation,
    # f32 bias add, cast back to the output dtype.  Np is padded to a multiple
    # of 128 in the wrapper so the output stores are lane-dense.
    acc = jnp.dot(x_ref[...], w_ref[...], preferred_element_type=jnp.float32)
    acc = acc + b_ref[...]                      # bias kept in f32
    o_ref[...] = acc.astype(o_ref.dtype)


def _vmem_budget_bytes():
    # Per-TensorCore VMEM capacity (v5e/v6e: 128 MiB, v7x: 64 MiB).  Leave
    # headroom for compiler scratch and never request more than ~56 MiB, so a
    # tile tuned on v6e cannot overshoot v7x's smaller VMEM.
    try:
        info = pltpu.get_tpu_info()
        cap = int(getattr(info, "vmem_capacity_bytes", 64 << 20))
    except Exception:  # hardware-query probe only; assume the smallest (v7x)
        cap = 64 << 20
    return min(cap - (8 << 20), 56 << 20)


def patch_embed_pallas(x, conv_weight, conv_bias, patch_size, *,
                       tm=512, compute_dtype=jnp.bfloat16):
    """PatchEmbed forward.

    x           : (B, C, H, W)
    conv_weight : (embed_dim, C, ph, pw)   -- PyTorch Conv2d layout
    conv_bias   : (embed_dim,)
    returns     : (B, num_patches, embed_dim) in x.dtype
    """
    B, C, H, W = x.shape
    ph, pw = patch_size
    gh, gw = H // ph, W // pw
    M = B * gh * gw
    patch_dim = C * ph * pw
    embed_dim = conv_weight.shape[0]
    out_dtype = x.dtype

    # im2col for a stride==kernel conv: pure layout plumbing, no overlap.
    # Token order (B, gh, gw) matches conv-output .flatten(2).transpose(1, 2);
    # patch-vector order (C, ph, pw) matches the Conv2d weight flattening.
    # The compute-dtype cast is fused into the same XLA op so only one
    # (M, patch_dim) buffer -- already bf16-width -- is materialized in HBM.
    # TODO(synk): fuse this im2col into the kernel via a strided BlockSpec on
    # the 6-D view of x (saves the remaining HBM round trip) once the in-VMEM
    # (C,ph,gw,pw)->(gw,C*ph*pw) relayout cost is validated with a bundle dump.
    patches = x.reshape(B, C, gh, ph, gw, pw)
    patches = patches.transpose(0, 2, 4, 1, 3, 5).reshape(M, patch_dim)
    patches = patches.astype(compute_dtype)

    # Flatten the conv weight to a GEMM weight (patch_dim, embed_dim).
    w = conv_weight.reshape(embed_dim, patch_dim).T.astype(compute_dtype)
    b2d = conv_bias.reshape(1, embed_dim).astype(jnp.float32)

    # Pad N up to a lane-dense multiple of 128 so stores are full `vst`
    # (embed_dim=96 would otherwise lower to masked partial stores).
    n_pad = _round_up(embed_dim, 128)
    if n_pad != embed_dim:
        w = jnp.pad(w, ((0, 0), (0, n_pad - embed_dim)))
        b2d = jnp.pad(b2d, ((0, 0), (0, n_pad - embed_dim)))

    in_size = jnp.dtype(compute_dtype).itemsize
    out_size = jnp.dtype(out_dtype).itemsize
    sub = 16 if in_size == 2 else 8          # sublane packing of the x tile

    # Token tile: large (amortizes ~0.35us/step pipeline overhead), but never
    # collapse the grid to a single step when M allows two -- v7x has two
    # TensorCores and the "parallel" axis must split across them.
    tm = _round_up(max(tm, sub), sub)
    tm = min(tm, max(_round_up(pl.cdiv(M, 2), sub), sub))

    # Shrink tm until the double-buffered tiles + resident weights + f32
    # accumulator fit the per-generation VMEM budget.
    budget = _vmem_budget_bytes()

    def need(t):
        return (2 * t * patch_dim * in_size          # x tile (double buffered)
                + 2 * t * n_pad * out_size           # out tile (double buffered)
                + 2 * patch_dim * n_pad * in_size    # weights (2 pipeline bufs)
                + 2 * n_pad * 4                      # bias
                + t * n_pad * 4)                     # f32 matmul result

    while need(tm) > budget and tm > sub:
        tm = max(sub, _round_up(tm // 2, sub))

    grid = (pl.cdiv(M, tm),)   # ragged last block: masked store, no jnp.pad
    vmem_limit = int(min(max(32 << 20, 2 * need(tm) + (4 << 20)), budget))

    flops = 2 * M * patch_dim * n_pad
    bytes_accessed = (M * patch_dim * in_size        # patches read
                      + patch_dim * n_pad * in_size  # weights read (once)
                      + n_pad * 4                    # bias read (once)
                      + M * n_pad * out_size)        # output written

    out = pl.pallas_call(
        _patch_embed_kernel,
        out_shape=jax.ShapeDtypeStruct((M, n_pad), out_dtype),
        grid_spec=pltpu.PrefetchScalarGridSpec(
            num_scalar_prefetch=0,
            grid=grid,
            in_specs=[
                pl.BlockSpec((tm, patch_dim), lambda i: (i, 0)),    # token tile
                pl.BlockSpec((patch_dim, n_pad), lambda i: (0, 0)),  # W (constant
                pl.BlockSpec((1, n_pad), lambda i: (0, 0)),          #  index -> fetched once)
            ],
            out_specs=pl.BlockSpec((tm, n_pad), lambda i: (i, 0)),
        ),
        compiler_params=pltpu.CompilerParams(
            dimension_semantics=("parallel",),
            vmem_limit_bytes=vmem_limit),
        cost_estimate=pl.CostEstimate(flops=flops, transcendentals=0,
                                      bytes_accessed=bytes_accessed),
    )(patches, w, b2d)

    if n_pad != embed_dim:
        out = out[:, :embed_dim]
    return out.reshape(B, gh * gw, embed_dim)


if __name__ == "__main__":
    # Small shapes consistent with the module defaults (in_chans=3, patch=4,
    # embed_dim=96), with a 16x16 image so it stays tiny.
    B = 2
    in_chans = 3
    img = 16
    patch = 4
    embed_dim = 96

    key = jax.random.PRNGKey(0)
    kx, kw, kb = jax.random.split(key, 3)

    x = jax.random.normal(kx, (B, in_chans, img, img), dtype=jnp.float32)
    conv_w = jax.random.normal(
        kw, (embed_dim, in_chans, patch, patch), jnp.float32) * 0.05
    conv_b = jax.random.normal(kb, (embed_dim,), jnp.float32) * 0.05

    y = patch_embed_pallas(x, conv_w, conv_b, (patch, patch))
    y = jax.block_until_ready(y)

    # Reference: the strided conv + flatten(2) + transpose(1, 2), exactly as
    # the PyTorch module computes it (norm_layer=None -> no norm), in f32.
    y_conv = jax.lax.conv_general_dilated(
        x, conv_w, window_strides=(patch, patch), padding="VALID",
        dimension_numbers=("NCHW", "OIHW", "NCHW"),
        precision=jax.lax.Precision.HIGHEST)
    y_conv = y_conv + conv_b.reshape(1, embed_dim, 1, 1)
    n_patches = (img // patch) * (img // patch)
    y_ref = y_conv.reshape(B, embed_dim, n_patches).transpose(0, 2, 1)

    assert y.shape == (B, n_patches, embed_dim)
    # bf16 GEMM inputs with f32 accumulation -> loosened tolerance vs f32 ref.
    err = float(jnp.max(jnp.abs(y - y_ref)))
    assert jnp.allclose(y, y_ref, atol=2e-2, rtol=2e-2), err

    print("KERNEL_OK")
</pallas_src>

<mosaic_0001>
module attributes {stable_mosaic.version = 11 : i64} {
  func.func @_patch_embed_kernel(%arg0: i32, %arg1: memref<16x48xbf16, #tpu.memory_space<vmem>>, %arg2: memref<48x128xbf16, #tpu.memory_space<vmem>>, %arg3: memref<1x128xf32, #tpu.memory_space<vmem>>, %arg4: memref<16x128xf32, #tpu.memory_space<vmem>>) attributes {dimension_semantics = [#tpu.dimension_semantics<parallel>], iteration_bounds = array<i64: 2>, scalar_prefetch = 0 : i64, scratch_operands = 0 : i64, tpu.core_type = #tpu.core_type<tc>, window_params = [{transform_indices = @transform_0, window_bounds = array<i64: 16, 48>}, {pipeline_mode = #tpu.pipeline_mode<synchronous>, transform_indices = @transform_1, window_bounds = array<i64: 48, 128>}, {pipeline_mode = #tpu.pipeline_mode<synchronous>, transform_indices = @transform_2, window_bounds = array<i64: 1, 128>}, {transform_indices = @transform_3, window_bounds = array<i64: 16, 128>}]} {
    %c0 = arith.constant 0 : index
    %c0_0 = arith.constant 0 : index
    %0 = vector.load %arg1[%c0, %c0_0] : memref<16x48xbf16, #tpu.memory_space<vmem>>, vector<16x48xbf16>
    %c0_1 = arith.constant 0 : index
    %c0_2 = arith.constant 0 : index
    %1 = vector.load %arg2[%c0_1, %c0_2] : memref<48x128xbf16, #tpu.memory_space<vmem>>, vector<48x128xbf16>
    %cst = arith.constant dense<0.000000e+00> : vector<16x128xf32>
    %2 = tpu.matmul %0, %1, %cst {dimension_numbers = #tpu.dot_dimension_numbers<[1], [0], [0], [1], [0, 0, 1, 1], [], []>} : vector<16x48xbf16>, vector<48x128xbf16>, vector<16x128xf32> -> vector<16x128xf32>
    %c0_3 = arith.constant 0 : index
    %c0_4 = arith.constant 0 : index
    %3 = vector.load %arg3[%c0_3, %c0_4] : memref<1x128xf32, #tpu.memory_space<vmem>>, vector<1x128xf32>
    %4 = vector.broadcast %3 : vector<1x128xf32> to vector<16x128xf32>
    %5 = arith.addf %2, %4 : vector<16x128xf32>
    %c0_5 = arith.constant 0 : index
    %c0_6 = arith.constant 0 : index
    %6 = vector.load %arg4[%c0_5, %c0_6] : memref<16x128xf32, #tpu.memory_space<vmem>>, vector<16x128xf32>
    tpu.vector_store %arg4[%c0_5, %c0_6], %5 {strides = array<i32>} : memref<16x128xf32, #tpu.memory_space<vmem>>, vector<16x128xf32>,
    return
  }
  func.func @transform_0(%arg0: i32) -> (i32, i32) {
    %c0_i32 = arith.constant 0 : i32
    %c0_i32_0 = arith.constant 0 : i32
    return %arg0, %c0_i32 : i32, i32
  }
  func.func @transform_1(%arg0: i32) -> (i32, i32) {
    %c0_i32 = arith.constant 0 : i32
    %c0_i32_0 = arith.constant 0 : i32
    %c0_i32_1 = arith.constant 0 : i32
    return %c0_i32, %c0_i32_0 : i32, i32
  }
  func.func @transform_2(%arg0: i32) -> (i32, i32) {
    %c0_i32 = arith.constant 0 : i32
    %c0_i32_0 = arith.constant 0 : i32
    %c0_i32_1 = arith.constant 0 : i32
    return %c0_i32, %c0_i32_0 : i32, i32
  }
  func.func @transform_3(%arg0: i32) -> (i32, i32) {
    %c0_i32 = arith.constant 0 : i32
    %c0_i32_0 = arith.constant 0 : i32
    return %arg0, %c0_i32 : i32, i32
  }
}

</mosaic_0001>

<bundles_post_ra>
// kernel: tpu_custom_call.1
= control target key start
LH: loop header
LB: loop body
LE: loop exit
PB: predicated region body
PF: predicated region fallthrough
CT: control target
= control target key end

     0   :  { %8 = vsyncpa [#allocation3], 0  ;;  %s864_s0 = inlined_call_operand.hbm [shape: bf16[32,48], index: 0, kind: input, shape index: {}]   ;;  %s865_s1 = inlined_call_operand.hbm [shape: bf16[48,128], index: 1, kind: input, shape index: {}]   ;;  %s866_s2 = inlined_call_operand.vmem [shape: f32[1,128], index: 2, kind: input, shape index: {}]   ;;  %s867_s3 = inlined_call_operand.hbm [shape: f32[32,128], index: 3, kind: output, shape index: {}]  }
   0x1   :  { %10 = vsyncpa [#allocation3 + $0x1], 0 }
   0x2   :  { %11 = vsyncpa [#allocation6], 0 }
   0x3   :  { %12 = vsyncpa [#allocation4], 0 }
   0x4   :  { %14 = vsyncpa [#allocation4 + $0x1], 0  ;;  %s653_s12 = smov 0   ;;  %s655_s13 = smov 0  }
   0x5   :  { %s657_s14 = smov 0   ;;  %s659_s15 = smov 0  }
   0x6 LB: > { %s674_s16 = sadd.s32 4294967295, %s622_s15   ;;  %s389_s17 = sadd.s32 4294967294, %s622_s15   ;;  %s622_s15 = sphi %s659_s15, %s887_s15   ;;  %s618_s14 = sphi %s657_s14, %s886_s14   ;;  %s614_s13 = sphi %s655_s13, %s885_s13   ;;  %s610_s12 = sphi %s653_s12, %s884_s12  }
   0x7   : > { %p40_p0 = scmp.ne.s32.totalorder %s614_s13, %s610_s12  ;;  %p868_p1 = scmp.eq.s32.totalorder %s674_s16, 0 }
   0x8   : > { %p112_p3 = scmp.eq.s32.totalorder %s389_s17, 1  ;;  %p390_p5 = scmp.ge.s32.totalorder %s622_s15, 1 }
   0x9   : > { %p683_p4 = por %p868_p1, %p40_p0  ;;  %p119_p7 = scmp.lt.s32.totalorder %s622_s15, 3 }
   0xa   : > { %p688_p6 = por %p112_p3, %p40_p0  ;;  %s624_s21 = smov [#allocation5]  }
   0xb   : > { %s871_s18 = scalar_select %p683_p4, 1, 0 }
   0xc   : > { %s872_s19 = scalar_select %p688_p6, 1, 0 }
   0xd   : > { %p693_p8 = pnand %p390_p5, %p119_p7  ;;  %s131_s22 = sshll.u32 %s624_s21, 4  ;;  %s697_s22 = int_to_ptr.vmem [resolvable:$true] %s131_s22 }
   0xe   : > { %s709_s24 = sadd.s32 1, %s622_s15   ;;  %s27_s25 = sadd.s32 1, %s618_s14 }
   0xf   : > { %s873_s20 = scalar_select %p693_p8, 1, 0 }
  0x10   : > { %p435_p9 = pneg %p693_p8  ;;  %s24_s26 = ssub.s32 %s622_s15, %s709_s24 }
  0x11   : > { %s494_s29 = scalar_lea.hbm %s865_s1, 384 }
  0x12   : > { %p704_p11 = pnand %p435_p9, %p868_p1  ;;  %p495_p12 = scmp.ne.s32.totalorder %s865_s1, %s494_s29 }
  0x13   : > { %p501_p5 = scmp.lt.u32.totalorder %s494_s29, %s865_s1 }
  0x14   : > { %p496_p13 = pneg %p704_p11 }
  0x16   : > { %p497_p0 = pnand %p496_p13, %p495_p12 }
  0x18   : > { %p498_p3 = pneg %p497_p0 }
  0x1a   : > { %p503_p7 = pnand %p501_p5, %p498_p3 }
  0x1c   : > { %506 = shalt.err (!%p503_p7)
}
  0x1d   : > { %s507_s7 = scalar_lea.vmem %s697_s22, 384  ;;  %p515_p2 = scmp.lt.s32.totalorder %s697_s22, %s697_s22 }
  0x1e   : > { %p508_p9 = scmp.ne.s32.totalorder %s697_s22, %s507_s7  ;;  %p516_p6 = scmp.lt.s32.totalorder %s507_s7, %s507_s7 }
  0x20   : > { %p510_p10 = pnand %p508_p9, %p496_p13  ;;  %p517_p4 = por %p516_p6, %p515_p2 }
  0x22   : > { %p511_p1 = pneg %p510_p10 }
  0x24   : > { %p518_p8 = pnand %p517_p4, %p511_p1 }
  0x26   : > { %521 = shalt.err (!%p518_p8)
}
  0x27   : > { %s625_s8 = smov 64   ;;  %s626_s9 = smov 4  }
  0x28   : > { %438 = dma.hbm_to_vmem [thread:$0]  (!%p704_p11), %s865_s1, 384, %s697_s22, [#allocation6], %s625_s8, %s625_s8, %s626_s9  }
  0x29   : > { %p25_p1 = scmp.eq.s32.totalorder %s24_s26, 0  ;;  %p34_p2 = scmp.ne.s32.totalorder %s618_s14, %s614_s13 }
  0x2a   : > { %p35_p4 = scmp.eq.s32.totalorder %s622_s15, 0  ;;  %p448_p6 = scmp.lt.s32.totalorder %s622_s15, 2 }
  0x2b   : > { %s743_s17 = scalar_select %p25_p1, %s618_s14, %s27_s25  }
  0x2c   : > { %p36_p8 = por %p35_p4, %p34_p2  ;;  %p875_p10 = scmp.eq.s32.totalorder %s674_s16, 1 }
  0x2d   : > { %s148_s23 = sand.u32 1, %s618_s14   ;;  %s411_s27 = sshll.u32 %s622_s15, 7 }
  0x2e   : > { %p747_p12 = por %p875_p10, %p34_p2  ;;  %s393_s28 = sshll.u32 %s148_s23, 3 }
  0x2f   : > { %s756_s4 = scalar_lea.hbm %s864_s0, %s411_s27  ;;  %s152_s22 = scalar_lea.vmem [#allocation2], %s393_s28 }
  0x30   : > { %s159_s25 = sshll.u32 %s152_s22, 4  ;;  %p758_p11 = pnand %p448_p6, %p36_p8  ;;  %s762_s25 = int_to_ptr.vmem [resolvable:$true] %s159_s25 }
  0x31   : > { %s764_s5 = scalar_lea.sflag [#allocation3], %s148_s23  ;;  %s522_s6 = scalar_lea.hbm %s756_s4, 128 }
  0x32   : > { %p523_p13 = scmp.ne.s32.totalorder %s756_s4, %s522_s6  ;;  %p524_p0 = pneg %p758_p11 }
  0x33   : > { %s527_s11 = scalar_lea.hbm %s864_s0, 256  ;;  %p528_p7 = scmp.lt.u32.totalorder %s756_s4, %s864_s0 }
  0x34   : > { %p525_p3 = pnand %p524_p0, %p523_p13  ;;  %p529_p9 = scmp.lt.u32.totalorder %s527_s11, %s522_s6 }
  0x35   : > { %p531_p2 = scmp.lt.u32.totalorder %s522_s6, %s756_s4 }
  0x36   : > { %p526_p5 = pneg %p525_p3  ;;  %p530_p1 = por %p529_p9, %p528_p7 }
  0x38   : > { %p532_p4 = por %p531_p2, %p530_p1 }
  0x3a   : > { %p533_p6 = pnand %p532_p4, %p526_p5 }
  0x3c   : > { %536 = shalt.err (!%p533_p6)
}
  0x3d   : > { %s537_s23 = scalar_lea.vmem %s762_s25, 128  ;;  %s627_s29 = smov [#allocation2]  }
  0x3e   : > { %p538_p8 = scmp.ne.s32.totalorder %s762_s25, %s537_s23  ;;  %s542_s30 = sshll.u32 %s627_s29, 4  ;;  %s543_s30 = int_to_ptr.vmem [resolvable:$false] %s542_s30 }
  0x3f   : > { %s544_s22 = scalar_lea.vmem %s543_s30, 256  ;;  %p545_p3 = scmp.lt.s32.totalorder %s762_s25, %s543_s30 }
  0x40   : > { %p540_p10 = pnand %p538_p8, %p524_p0  ;;  %p546_p7 = scmp.lt.s32.totalorder %s544_s22, %s537_s23 }
  0x42   : > { %p541_p13 = pneg %p540_p10  ;;  %p547_p9 = por %p546_p7, %p545_p3 }
  0x44   : > { %p548_p1 = pnand %p547_p9, %p541_p13 }
  0x46   : > { %551 = shalt.err (!%p548_p1)
}
  0x47   : > { %442 = dma.hbm_to_vmem [thread:$0]  (!%p758_p11), %s756_s4, 128, %s762_s25, %s764_s5, %s625_s8, %s625_s8, %s626_s9  }
  0x48   : > { %p878_p0 = scmp.ne.s32.totalorder %s873_s20, 0 }
  0x49   : > { %s798_s6 = sand.u32 (!%p878_p0), 1, %s614_s13   ;;  %p879_p5 = scmp.ne.s32.totalorder (!%p878_p0), %s871_s18, 0 }
  0x4a   : > { %171 = sbr.rel (%p878_p0) target bundleno = 329 (0x149), region = 32  ;;  %s397_s7 = sshll.u32 (!%p878_p0), %s798_s6, 3 }
  0x4b   : > { %s174_s10 = scalar_lea.sflag (!%p878_p0), [#allocation3], %s798_s6  ;;  %s177_s11 = scalar_lea.vmem (!%p878_p0), [#allocation2], %s397_s7 }
  0x51   : > { %597 = dma.done.wait (%p879_p5), %s174_s10, 128  }
  0x52   : > { %599 = vsyncadd (%p879_p5), %s174_s10, 4294967168  ;;  %p880_p2 = scmp.eq.s32.totalorder %s674_s16, 0 }
  0x54   : > { %601 = dma.done.wait (%p880_p2), [#allocation6], 384   ;;  %p881_p11 = pmov %p880_p2 }
  0x55   : > { %v628_v0 = vmov 0.0   ;;  %vm629_vm0 = vmmov 0   ;;  %v490_v1 = vld [vmem:[#allocation5] sm:$0xff]   ;;  %v491_v2 = vld [vmem:[#allocation5 + $0x8] sm:$0xff]   ;;  %v492_v3 = vld [vmem:[#allocation5 + $0x10] sm:$0xff]   ;;  %vm245_vm1 = vcmask 392192  }
  0x56   : > { %603 = vsyncadd (%p881_p11), [#allocation6], 4294966912  ;;  %417 = vmatprep.subr.bf16.mxu0 %v628_v0  ;;  %423 = vmatprep.mubr.msk.bf16.mxu0 %vm629_vm0, %v628_v0  ;;  %v493_v4 = vld [vmem:[%s177_s11] sm:$0xff]   ;;  %s399_s18 = sshll.u32 %s798_s6, 4  ;;  %s412_s25 = sshll.u32 %s674_s16, 8 }
  0x57   : > { %418 = vmatpush3.bf16.msra.mxu0 %v490_v1  ;;  %v400_v5 = vld [vmem:[%s866_s2] ss:$0 sm:$0xff]  ;;  %s203_s9 = scalar_lea.vmem [#allocation7], %s399_s18  ;;  %s820_s27 = scalar_lea.hbm %s867_s3, %s412_s25 }
  0x58   : > { %419 = vmatprep.subr.bf16.mxu0 %v628_v0  ;;  %s306_s4 = sshll.u32 %s203_s9, 4  ;;  %s293_s28 = scalar_lea.sflag [#allocation4], %s798_s6  ;;  %s815_s4 = int_to_ptr.vmem [resolvable:$true] %s306_s4 }
  0x59   : > { %s552_s16 = scalar_lea.vmem %s815_s4, 256  ;;  %s630_s23 = smov [#allocation7]  }
  0x5a   : > { %p553_p4 = scmp.ne.s32.totalorder %s815_s4, %s552_s16  ;;  %s556_s29 = sshll.u32 %s630_s23, 4  ;;  %s557_s29 = int_to_ptr.vmem [resolvable:$false] %s556_s29 }
  0x5b   : > { %420 = vmatpush3.bf16.msra.mxu0 %v491_v2  ;;  %s558_s30 = scalar_lea.vmem %s557_s29, 512  ;;  %p559_p10 = scmp.lt.s32.totalorder %s815_s4, %s557_s29 }
  0x5c   : > { %421 = vmatprep.subr.bf16.mxu0 %v628_v0  ;;  %p554_p6 = pnand %p553_p4, %p747_p12  ;;  %p560_p13 = scmp.lt.s32.totalorder %s558_s30, %s552_s16 }
  0x5e   : > { %p555_p8 = pneg %p554_p6  ;;  %p561_p3 = por %p560_p13, %p559_p10 }
  0x5f   : > { %422 = vmatpush3.bf16.msra.mxu0 %v492_v3 }
  0x60   : > { %p562_p7 = pnand %p561_p3, %p555_p8 }
  0x62   : > { %424 = vmatmul.mubr.msk.bf16.vlgmr.msra.gmra.mrb[0].mxu0 %vm245_vm1, %v493_v4 }
 0x135   : > { %v283_v6 = vpop.f32.mrb[0].mxu0 }
 0x136   : > { %v284_v7 = vadd.f32 %v400_v5, %v283_v6  ;;  %v425_v8 = vpop.f32.mrb[1].mxu0 }
 0x137   : > { %v286_v9 = vpop.f32.mrb[2].mxu0 }
 0x138   : > { %290 = vst [vmem:[%s203_s9] sm:$0xff] %v284_v7  ;;  %v287_v10 = vadd.f32 %v400_v5, %v286_v9  ;;  %v426_v11 = vpop.f32.mrb[3].mxu0 }
 0x13a   : > { %291 = vst [vmem:[%s203_s9 + $0x8] sm:$0xff] %v287_v10 }
 0x13b   : > { %565 = shalt.err (!%p562_p7)
}
 0x13c   : > { %s566_s22 = scalar_lea.hbm %s820_s27, 256  ;;  %s570_s11 = scalar_lea.hbm %s867_s3, 512 }
 0x13d   : > { %p567_p9 = scmp.ne.s32.totalorder %s820_s27, %s566_s22  ;;  %p571_p5 = scmp.lt.u32.totalorder %s820_s27, %s867_s3 }
 0x13e   : > { %p572_p2 = scmp.lt.u32.totalorder %s570_s11, %s566_s22  ;;  %p574_p4 = scmp.lt.u32.totalorder %s566_s22, %s820_s27 }
 0x13f   : > { %p568_p1 = pnand %p567_p9, %p747_p12 }
 0x140   : > { %p573_p11 = por %p572_p2, %p571_p5 }
 0x141   : > { %p569_p0 = pneg %p568_p1 }
 0x142   : > { %p575_p6 = por %p574_p4, %p573_p11 }
 0x144   : > { %p576_p8 = pnand %p575_p6, %p569_p0 }
 0x146   : > { %579 = shalt.err (!%p576_p8)
}
 0x147   : > { %s631_s8 = smov 128   ;;  %s632_s9 = smov 8  }
 0x148   : > { %433 = dma.vmem_to_hbm [thread:$0]  (%p747_p12), %s815_s4, 256, %s820_s27, %s293_s28, %s631_s8, %s631_s8, %s632_s9  }
 0x149 PF: > { %s321_s25 = sand.u32 1, %s610_s12   ;;  %p882_p10 = scmp.ne.s32.totalorder %s872_s19, 0 }
 0x14a   : > { %p883_p13 = scmp.ge.s32.totalorder %s622_s15, 2  ;;  %s322_s26 = scalar_lea.sflag [#allocation4], %s321_s25 }
 0x14c   : > { %p444_p3 = pnand %p883_p13, %p882_p10 }
 0x14e   : > { %605 = dma.done.wait (!%p444_p3), %s322_s26, 256  }
 0x14f   : > { %607 = vsyncadd (!%p444_p3), %s322_s26, 4294967040  ;;  %p17_p7 = scmp.ge.s32.totalorder %s709_s24, 4   ;;  %s884_s12 = smov %s614_s13 }
 0x150   : > { %s885_s13 = smov %s618_s14  ;;  %s886_s14 = smov %s743_s17 }
 0x151   : > { %s887_s15 = smov %s709_s24  ;;  %19 = sbr.rel (!%p17_p7) target bundleno = 6 (0x6), region = 81 }
 0x158   :  { %327 = vsyncpa [#allocation3], 1 }
 0x159   :  { %329 = vsyncpa [#allocation3 + $0x1], 1 }
 0x15a   :  { %330 = vsyncpa [#allocation6], 1 }
 0x15b   :  { %331 = vsyncpa [#allocation4], 1 }
 0x15c   :  { %333 = vsyncpa [#allocation4 + $0x1], 1 }

</bundles_post_ra>
